<compile_context>
chip_gen: v5e
topology: v5e:2x2
jax: 0.10.0
libtpu: 0.0.40
codegen_flags: <defaults>
</compile_context>

<pallas_src>
import functools

import jax
import jax.numpy as jnp
from jax.experimental import pallas as pl
from jax.experimental.pallas import tpu as pltpu

_LANE = 128


def xor_tap_kernel(x_ref, o_ref, *, taps):
    # x_ref: (num_bits, tile_batch) -- batch on the lane axis.
    # Taps are static Python ints, so each row select is a static sublane slice.
    acc = x_ref[taps[0]:taps[0] + 1, :]            # (1, tile_batch)
    for t in taps[1:]:
        acc = jnp.bitwise_xor(acc, x_ref[t:t + 1, :])
    o_ref[...] = acc                               # lane-dense, unmasked store


def xor_tap_forward(x, taps, *, max_tile_lanes=64 * 1024,
                    vmem_limit_bytes=32 * 1024 * 1024):
    """x: (batch, num_bits) int array; taps: sequence of static ints.

    Returns the XOR of the tapped columns, shape (batch,), same dtype as x.
    """
    batch, num_bits = x.shape
    taps = tuple(int(t) for t in taps)
    if not taps:
        raise ValueError("taps must be non-empty")
    for t in taps:
        if not 0 <= t < num_bits:
            raise ValueError(f"tap index {t} out of range for num_bits={num_bits}")

    # Transpose so batch lives on the lane axis (wrapper-side layout change).
    x_t = jnp.transpose(x)                         # (num_bits, batch)

    # Tile selection: biggest lane tile that keeps the double-buffered working
    # set (2 * input tile + 2 * output tile) under a budget that is safe on
    # every generation (v7x has only 64 MiB physical VMEM).
    itemsize = jnp.dtype(x.dtype).itemsize
    vmem_budget = 16 * 1024 * 1024
    max_tile = (vmem_budget // (2 * itemsize * (num_bits + 1))) // _LANE * _LANE
    max_tile = max(_LANE, min(max_tile, max_tile_lanes))

    padded = pl.cdiv(batch, _LANE) * _LANE
    tile = min(padded, max_tile)
    padded = pl.cdiv(padded, tile) * tile          # multiple of the tile
    if padded != batch:
        x_t = jnp.pad(x_t, ((0, 0), (0, padded - batch)))

    kernel = functools.partial(xor_tap_kernel, taps=taps)
    grid = (padded // tile,)

    out = pl.pallas_call(
        kernel,
        out_shape=jax.ShapeDtypeStruct((1, padded), x.dtype),
        grid=grid,
        in_specs=[pl.BlockSpec((num_bits, tile), lambda i: (0, i))],
        out_specs=pl.BlockSpec((1, tile), lambda i: (0, i)),
        compiler_params=pltpu.CompilerParams(
            dimension_semantics=("parallel",),
            vmem_limit_bytes=vmem_limit_bytes,
        ),
    )(x_t)
    return out[0, :batch]


def xor_tap_reference(x, taps):
    acc = x[:, taps[0]]
    for t in taps[1:]:
        acc = jnp.bitwise_xor(acc, x[:, t])
    return acc


if __name__ == "__main__":
    key = jax.random.PRNGKey(0)
    taps = (0, 2, 3, 5)  # LFSR-style tap positions (static module "parameters")

    # Small primary shape consistent with the module.
    batch, num_bits = 8, 16
    x = jax.random.randint(key, (batch, num_bits), 0, 2, dtype=jnp.int32)

    y = xor_tap_forward(x, taps)
    jax.block_until_ready(y)
    y_ref = xor_tap_reference(x, taps)
    assert y.shape == (batch,)
    assert bool(jnp.all(y == y_ref))

    # Extra check with a non-lane-aligned batch (exercises padding + tiling).
    key2 = jax.random.PRNGKey(1)
    x2 = jax.random.randint(key2, (300, num_bits), 0, 2, dtype=jnp.int32)
    y2 = xor_tap_forward(x2, taps)
    jax.block_until_ready(y2)
    assert bool(jnp.all(y2 == xor_tap_reference(x2, taps)))

    print("KERNEL_OK")
</pallas_src>

<mosaic_0001>
module attributes {stable_mosaic.version = 11 : i64} {
  func.func @xor_tap_kernel(%arg0: i32, %arg1: memref<16x128xi32, #tpu.memory_space<vmem>>, %arg2: memref<1x128xi32, #tpu.memory_space<vmem>>) attributes {dimension_semantics = [#tpu.dimension_semantics<parallel>], iteration_bounds = array<i64: 1>, scalar_prefetch = 0 : i64, scratch_operands = 0 : i64, tpu.core_type = #tpu.core_type<tc>, window_params = [{transform_indices = @transform_0, window_bounds = array<i64: 16, 128>}, {transform_indices = @transform_1, window_bounds = array<i64: 1, 128>}]} {
    %c0 = arith.constant 0 : index
    %c0_0 = arith.constant 0 : index
    %0 = vector.load %arg1[%c0, %c0_0] : memref<16x128xi32, #tpu.memory_space<vmem>>, vector<1x128xi32>
    %c2 = arith.constant 2 : index
    %c0_1 = arith.constant 0 : index
    %1 = vector.load %arg1[%c2, %c0_1] : memref<16x128xi32, #tpu.memory_space<vmem>>, vector<1x128xi32>
    %2 = arith.xori %0, %1 : vector<1x128xi32>
    %c3 = arith.constant 3 : index
    %c0_2 = arith.constant 0 : index
    %3 = vector.load %arg1[%c3, %c0_2] : memref<16x128xi32, #tpu.memory_space<vmem>>, vector<1x128xi32>
    %4 = arith.xori %2, %3 : vector<1x128xi32>
    %c5 = arith.constant 5 : index
    %c0_3 = arith.constant 0 : index
    %5 = vector.load %arg1[%c5, %c0_3] : memref<16x128xi32, #tpu.memory_space<vmem>>, vector<1x128xi32>
    %6 = arith.xori %4, %5 : vector<1x128xi32>
    %c0_4 = arith.constant 0 : index
    %c0_5 = arith.constant 0 : index
    %7 = vector.load %arg2[%c0_4, %c0_5] : memref<1x128xi32, #tpu.memory_space<vmem>>, vector<1x128xi32>
    tpu.vector_store %arg2[%c0_4, %c0_5], %6 {strides = array<i32>} : memref<1x128xi32, #tpu.memory_space<vmem>>, vector<1x128xi32>,
    return
  }
  func.func @transform_0(%arg0: i32) -> (i32, i32) {
    %c0_i32 = arith.constant 0 : i32
    %c0_i32_0 = arith.constant 0 : i32
    return %c0_i32, %arg0 : i32, i32
  }
  func.func @transform_1(%arg0: i32) -> (i32, i32) {
    %c0_i32 = arith.constant 0 : i32
    %c0_i32_0 = arith.constant 0 : i32
    return %c0_i32, %arg0 : i32, i32
  }
}

</mosaic_0001>

<bundles_post_ra>
// kernel: tpu_custom_call.1
= control target key start
LH: loop header
LB: loop body
LE: loop exit
PB: predicated region body
PF: predicated region fallthrough
CT: control target
= control target key end

     0   :  { %6 = vsyncpa [#allocation3], 0  ;;  %s126_s0 = inlined_call_operand.hbm [shape: s32[16,128], index: 0, kind: input, shape index: {}]   ;;  %s127_s1 = inlined_call_operand.hbm [shape: s32[1,128], index: 1, kind: output, shape index: {}]  }
   0x1   :  { %7 = vsyncpa [#allocation4], 0  ;;  %s12_s8 = sshll.u32 %s126_s0, 4  ;;  %s106_s9 = smov [#allocation2]   ;;  %s13_s8 = int_to_ptr.hbm [resolvable:$true] %s12_s8 }
   0x2   :  { %s14_s10 = sshll.u32 %s106_s9, 4  ;;  %s107_s11 = smov 128   ;;  %s15_s10 = int_to_ptr.vmem [resolvable:$true] %s14_s10 }
   0x3   :  { %s108_s12 = smov 8  }
   0x4   :  { %20 = dma.hbm_to_vmem [thread:$0]  %s13_s8, 256, %s15_s10, [#allocation3], %s107_s11, %s107_s11, %s108_s12  }
   0x5   :  { %102 = dma.done.wait [#allocation3], 256  }
   0x6   :  { %103 = vsyncadd [#allocation3], 4294967040  ;;  %v25_v0 = vld [vmem:[#allocation2] sm:$0x1]  ;;  %v26_v1 = vld [vmem:[#allocation2 + $0x2] sm:$0x1] }
   0x7   :  { %v28_v2 = vld [vmem:[#allocation2 + $0x3] sm:$0x1]  ;;  %v27_v3 = vxor.u32 %v26_v1, %v25_v0  ;;  %v30_v4 = vld [vmem:[#allocation2 + $0x5] sm:$0x1]  ;;  %s109_s13 = smov [#allocation5]   ;;  %s40_s0 = sshll.u32 %s127_s1, 4  ;;  %s41_s0 = int_to_ptr.hbm [resolvable:$true] %s40_s0 }
   0x8   :  { %s38_s14 = sshll.u32 %s109_s13, 4  ;;  %s39_s14 = int_to_ptr.vmem [resolvable:$true] %s38_s14 }
   0x9   :  { %v29_v5 = vxor.u32 %v28_v2, %v27_v3 }
   0xb   :  { %v31_v6 = vxor.u32 %v30_v4, %v29_v5 }
   0xd   :  { %32 = vst [vmem:[#allocation5] sm:$0x1] %v31_v6 }
   0xe   :  { %43 = dma.vmem_to_hbm [thread:$0]  %s39_s14, 16, %s41_s0, [#allocation4]  }
   0xf   :  { %104 = dma.done.wait [#allocation4], 16  }
  0x10   :  { %105 = vsyncadd [#allocation4], 4294967280 }
  0x11   :  { %48 = vsyncpa [#allocation3], 1 }
  0x12   :  { %49 = vsyncpa [#allocation4], 1 }

</bundles_post_ra>
